<compile_context>
chip_gen: v6e
topology: v6e:2x2x1
jax: 0.10.0
libtpu: 0.0.40
codegen_flags: <defaults>
</compile_context>

<pallas_src>
import functools

import jax
import jax.numpy as jnp
import numpy as np
from jax.experimental import pallas as pl
from jax.experimental.pallas import tpu as pltpu


def _round_up(n, m):
    return ((n + m - 1) // m) * m


def _cdiv(a, b):
    return -(-a // b)


# ----------------------------------------------------------------------------
# one-off device probes / hardware queries
# ----------------------------------------------------------------------------
@functools.lru_cache(maxsize=None)
def _roll_matches_jnp():
    """Probe whether pltpu.roll uses jnp.roll's shift direction on this backend.

    The FM weight layout depends on which field lands in which lane slot after the
    roll, so we probe once (cached) and build the weights to match.
    """
    def probe_kernel(x_ref, o_ref):
        o_ref[...] = pltpu.roll(x_ref[...], shift=1, axis=1)

    x = jnp.broadcast_to(jnp.arange(128, dtype=jnp.float32), (8, 128))
    out = pl.pallas_call(
        probe_kernel, out_shape=jax.ShapeDtypeStruct((8, 128), jnp.float32))(x)
    first = float(out[0, 0])
    if first == 127.0:      # out[i] = x[(i - shift) % N]  (jnp.roll convention)
        return True
    if first == 1.0:        # out[i] = x[(i + shift) % N]
        return False
    raise RuntimeError(f"unexpected pltpu.roll behaviour (probe read {first})")


@functools.lru_cache(maxsize=None)
def _vmem_limit_bytes():
    """Explicit scoped-VMEM limit: ~85% of per-core capacity, 64 MiB fallback."""
    try:
        return int(pltpu.get_tpu_info().vmem_capacity_bytes * 0.85)
    except Exception:
        return 64 * 1024 * 1024


# ----------------------------------------------------------------------------
# Pallas kernel: one batch tile per grid step, everything fused into a few matmuls.
# ----------------------------------------------------------------------------
def _make_kernel(F, E):
    P = F * (F - 1) // 2
    deltas = tuple(range(1, F // 2 + 1))   # field-index deltas covering all P pairs

    def kernel(xc_ref, w1_ref, b1_ref, w2m_ref, *rest):
        if P > 0:
            w2f_ref, b2_ref, out_ref = rest
        else:
            b2_ref, out_ref = rest

        xc = xc_ref[...]                                             # [TM, F*E]

        # Fused first layer: columns = [sum-MLP hidden | con-MLP hidden | deep-DNN hidden]
        h = jnp.dot(xc, w1_ref[...], preferred_element_type=jnp.float32)
        h = jnp.maximum(h + b1_ref[...], 0.0).astype(xc.dtype)       # [TM, 4E + 8FE]

        # Fused (block-structured) second layer -> lane-dense [TM, 4*E] output slab.
        out = jnp.dot(h, w2m_ref[...], preferred_element_type=jnp.float32)

        # Pairwise field interactions: F//2 lane-dense XLU rolls + full-width VPU
        # multiplies; the per-pair reduction over E is folded into the row-repeated FM
        # weights, so it happens inside the MXU accumulation.  No lane slicing, no
        # concat, no cross-lane reductions in the kernel.
        if P > 0:
            for di, d in enumerate(deltas):
                prods = xc * pltpu.roll(xc, shift=d * E, axis=1)     # [TM, F*E]
                out = out + jnp.dot(prods, w2f_ref[di],
                                    preferred_element_type=jnp.float32)

        out_ref[...] = (out + b2_ref[...]).astype(out_ref.dtype)

    return kernel


# ----------------------------------------------------------------------------
# Weight fusion (wrapper-side): wide / block-structured / roll-mapped weights.
# ----------------------------------------------------------------------------
def _fuse_params(params, F, E, matmul_dtype, roll_like_jnp):
    f32 = jnp.float32
    P = F * (F - 1) // 2
    H1 = 4 * E          # Sum_MLP hidden width
    H2 = 4 * F * E      # Con_MLP / DeepFM hidden width
    Htot = H1 + 2 * H2

    g = lambda k: params[k].astype(f32)
    w1s, b1s, w2s, b2s = g("w1s"), g("b1s"), g("w2s"), g("b2s")
    w1c, b1c, w2c, b2c = g("w1c"), g("b1c"), g("w2c"), g("b2c")
    wfm, bfm = g("wfm"), g("bfm")
    w1d, b1d, w2d, b2d = g("w1d"), g("b1d"), g("w2d"), g("b2d")
    wfmd, bfmd = g("wfmd"), g("bfmd")

    # Fused first layer:  x.sum(1) @ w1s == xc @ tile(w1s, (F, 1))
    W1 = jnp.concatenate([jnp.tile(w1s, (F, 1)), w1c, w1d], axis=1)   # [F*E, Htot]
    b1 = jnp.concatenate([b1s, b1c, b1d], axis=1)                     # [1, Htot]

    # Fused second layer, block structure -> output cols [sum | con | fm | deep]
    W2m = jnp.zeros((Htot, 4 * E), f32)
    W2m = W2m.at[0:H1, 0:E].set(w2s)
    W2m = W2m.at[H1:H1 + H2, E:2 * E].set(w2c)
    W2m = W2m.at[H1 + H2:Htot, 3 * E:4 * E].set(w2d)

    if P > 0:
        # Roll-mapped FM weights.  For delta d, lane slot s of (xc * roll(xc, d*E))
        # holds x_s * x_{(s -/+ d) mod F}; the pair's weight row (repeated E times so
        # the sum over E happens on the MXU) is assigned to exactly one occurrence of
        # each pair, all other slots get zero rows.
        n_d = F // 2
        pairs = [(i, j) for i in range(F) for j in range(i + 1, F)]
        pair_idx = {p: n for n, p in enumerate(pairs)}
        sel = np.zeros((n_d * F, P), np.float32)
        seen = set()
        for di, d in enumerate(range(1, n_d + 1)):
            for s in range(F):
                o = (s - d) % F if roll_like_jnp else (s + d) % F
                p = (min(s, o), max(s, o))
                if p in seen:          # duplicate coverage (even F, d == F/2): zero row
                    continue
                seen.add(p)
                sel[di * F + s, pair_idx[p]] = 1.0
        assert len(seen) == P
        sel = jnp.asarray(sel)                                         # [n_d*F, P]
        fm_rows = jnp.repeat(sel @ wfm, E, axis=0)                     # [n_d*F*E, E]
        fmd_rows = jnp.repeat(sel @ wfmd, E, axis=0)                   # [n_d*F*E, E]
        W2f = jnp.concatenate(
            [jnp.zeros((n_d * F * E, 2 * E), f32), fm_rows, fmd_rows],
            axis=1).reshape(n_d, F * E, 4 * E)
        bfm_eff = bfm
    else:
        # PyTorch emits literal zeros for the FM mode when num_fields == 1;
        # DeepFM's fm_out(empty) reduces to its bias only.
        W2f = None
        bfm_eff = jnp.zeros((1, E), f32)

    b2 = jnp.concatenate([b2s, b2c, bfm_eff, b2d + bfmd], axis=1)      # [1, 4E]

    if matmul_dtype is not None:
        W1 = W1.astype(matmul_dtype)
        W2m = W2m.astype(matmul_dtype)
        if W2f is not None:
            W2f = W2f.astype(matmul_dtype)
    return W1, b1, W2m, W2f, b2


# ----------------------------------------------------------------------------
# batch-tile selection: minimize padding, keep >= 2 steps (v7x megacore), big tiles
# when F*E is small so the per-step overhead is amortized.
# ----------------------------------------------------------------------------
def _pick_batch_tile(B, fe, block_rows):
    if block_rows is None:
        block_rows = 1024 if fe <= 512 else (512 if fe <= 2048 else 256)
    max_tm = max(16, min(block_rows, _round_up(B, 16)))
    min_steps = 2 if B > 16 else 1
    n_steps = max(_cdiv(B, max_tm), min_steps)
    return _round_up(_cdiv(B, n_steps), 16)     # multiple of 16 sublanes (f32 & bf16)


# ----------------------------------------------------------------------------
# Wrapper: batch-tiled pipelined pallas_call with VMEM-resident weights.
# ----------------------------------------------------------------------------
def row_emb_forward(x_emb, params, *, block_rows=None, matmul_dtype=jnp.bfloat16):
    """RowEmb_mod forward, mode_list = ['Sum_MLP', 'Con_MLP', 'FM', 'DeepFM'].

    Returns [B, 4, E].  matmul_dtype=jnp.bfloat16 (default) uses bf16 MXU inputs with
    f32 accumulation; matmul_dtype=None keeps all matmul inputs in f32.
    """
    B, F, E = x_emb.shape
    P = F * (F - 1) // 2

    W1, b1, W2m, W2f, b2 = _fuse_params(
        params, F, E, matmul_dtype, roll_like_jnp=_roll_matches_jnp())

    # lane-dense flattened input (reshape outside the kernel)
    xc = x_emb.reshape(B, F * E)
    if matmul_dtype is not None:
        xc = xc.astype(matmul_dtype)

    tm = _pick_batch_tile(B, F * E, block_rows)
    B_pad = _round_up(B, tm)
    if B_pad != B:
        xc = jnp.pad(xc, ((0, B_pad - B), (0, 0)))

    in_arrays = [xc, W1, b1, W2m] + ([W2f] if P > 0 else []) + [b2]
    kernel = _make_kernel(F, E)

    def run(single_buffer_weights):
        in_specs = [pl.BlockSpec((tm, F * E), lambda i: (i, 0))]
        for a in in_arrays[1:]:
            kw = ({"pipeline_mode": pl.Buffered(buffer_count=1)}
                  if single_buffer_weights else {})
            in_specs.append(
                pl.BlockSpec(a.shape, (lambda i, _nd=a.ndim: (0,) * _nd), **kw))
        return pl.pallas_call(
            kernel,
            out_shape=jax.ShapeDtypeStruct((B_pad, 4 * E), x_emb.dtype),
            grid=(B_pad // tm,),
            in_specs=in_specs,
            out_specs=pl.BlockSpec((tm, 4 * E), lambda i: (i, 0)),
            compiler_params=pltpu.CompilerParams(
                dimension_semantics=("parallel",),      # shard batch steps across TCs
                vmem_limit_bytes=_vmem_limit_bytes()),
        )(*in_arrays)

    try:
        # grid-invariant weights single-buffered -> half the weight VMEM footprint
        out_flat = run(True)
    except Exception:
        # TODO(synk): pipeline_mode=pl.Buffered(1) not accepted by this jax version;
        # fall back to default double-buffered weight blocks.
        out_flat = run(False)

    return out_flat[:B].reshape(B, 4, E)


# ----------------------------------------------------------------------------
# deterministic parameter init (PyTorch-Linear-style uniform fan_in init)
# ----------------------------------------------------------------------------
def init_params(key, num_fields, embedding_size):
    F, E = num_fields, embedding_size
    P = F * (F - 1) // 2

    def linear(k, fan_in, fan_out):
        kw, kb = jax.random.split(k)
        bound = 1.0 / np.sqrt(fan_in)
        w = jax.random.uniform(kw, (fan_in, fan_out), jnp.float32, -bound, bound)
        b = jax.random.uniform(kb, (1, fan_out), jnp.float32, -bound, bound)
        return w, b

    ks = jax.random.split(key, 8)
    params = {}
    params["w1s"], params["b1s"] = linear(ks[0], E, 4 * E)              # Sum_MLP
    params["w2s"], params["b2s"] = linear(ks[1], 4 * E, E)
    params["w1c"], params["b1c"] = linear(ks[2], F * E, 4 * F * E)      # Con_MLP
    params["w2c"], params["b2c"] = linear(ks[3], 4 * F * E, E)
    params["wfm"], params["bfm"] = linear(ks[4], max(P, 1), E)          # FM
    params["w1d"], params["b1d"] = linear(ks[5], F * E, 4 * F * E)      # DeepFM MLP
    params["w2d"], params["b2d"] = linear(ks[6], 4 * F * E, E)
    params["wfmd"], params["bfmd"] = linear(ks[7], max(P, 1), E)        # DeepFM fm_out
    return params


# ----------------------------------------------------------------------------
# pure-JAX reference (mirrors the PyTorch forward, unfused) for correctness checks
# ----------------------------------------------------------------------------
def reference(x, p):
    B, F, E = x.shape

    def mlp(z, w1, b1, w2, b2):
        return jnp.maximum(z @ w1 + b1, 0.0) @ w2 + b2

    out_sum = mlp(x.sum(1), p["w1s"], p["b1s"], p["w2s"], p["b2s"])
    xc = x.reshape(B, F * E)
    out_con = mlp(xc, p["w1c"], p["b1c"], p["w2c"], p["b2c"])
    pairs = [(i, j) for i in range(F) for j in range(i + 1, F)]
    inter = jnp.stack([jnp.sum(x[:, i, :] * x[:, j, :], -1) for i, j in pairs], -1)
    out_fm = inter @ p["wfm"] + p["bfm"]
    out_deep = (mlp(xc, p["w1d"], p["b1d"], p["w2d"], p["b2d"])
                + inter @ p["wfmd"] + p["bfmd"])
    return jnp.stack([out_sum, out_con, out_fm, out_deep], axis=1)


def _emulate_bf16_inputs(x, params):
    """Round x and weights through bf16 (biases stay f32) to mirror the bf16 MXU path."""
    bf = jnp.bfloat16
    x_q = x.astype(bf).astype(jnp.float32)
    p_q = {k: (v.astype(bf).astype(jnp.float32) if k.startswith("w") else v)
           for k, v in params.items()}
    return x_q, p_q


if __name__ == "__main__":
    def run_case(B, F, E, case_key):
        kx, kp = jax.random.split(case_key)
        x_emb = jax.random.normal(kx, (B, F, E), dtype=jnp.float32)
        params = init_params(kp, F, E)
        ref = reference(x_emb, params)

        # f32-input MXU path (tight check against the f32 reference)
        out32 = jax.block_until_ready(row_emb_forward(x_emb, params, matmul_dtype=None))
        assert out32.shape == (B, 4, E), out32.shape
        np.testing.assert_allclose(np.asarray(out32), np.asarray(ref),
                                   rtol=3e-3, atol=3e-3)

        # default bf16-input / f32-accumulate MXU path; compared against a
        # bf16-rounded-input reference (kernel has extra in-kernel bf16 roundings of
        # the ReLU output and the pairwise products, hence the loose tolerance).
        out16 = jax.block_until_ready(row_emb_forward(x_emb, params))
        ref16 = reference(*_emulate_bf16_inputs(x_emb, params))
        np.testing.assert_allclose(np.asarray(out16), np.asarray(ref16),
                                   rtol=1e-1, atol=1e-1)

    k1, k2 = jax.random.split(jax.random.PRNGKey(0))
    # F*E = 128: tm=160, 2-step grid, 20 padded rows; dup-pair zeroing at d = F/2.
    run_case(300, 4, 32, k1)
    # F*E = 384, E not a multiple of 128: exercises multi-delta sub-128 lane rolls.
    run_case(100, 8, 48, k2)
    print("KERNEL_OK")
</pallas_src>

<mosaic_0001>
module attributes {stable_mosaic.version = 11 : i64} {
  func.func @probe_kernel(%arg0: memref<8x128xf32, #tpu.memory_space<vmem>>, %arg1: memref<8x128xf32, #tpu.memory_space<vmem>>) attributes {dimension_semantics = [], scalar_prefetch = 0 : i64, scratch_operands = 0 : i64, tpu.core_type = #tpu.core_type<tc>} {
    %c0 = arith.constant 0 : index
    %c0_0 = arith.constant 0 : index
    %0 = vector.load %arg0[%c0, %c0_0] : memref<8x128xf32, #tpu.memory_space<vmem>>, vector<8x128xf32>
    %c1_i32 = arith.constant 1 : i32
    %1 = tpu.dynamic_rotate %0 by %c1_i32 dim 1 : vector<8x128xf32>, i32 -> vector<8x128xf32>
    %c0_1 = arith.constant 0 : index
    %c0_2 = arith.constant 0 : index
    %2 = vector.load %arg1[%c0_1, %c0_2] : memref<8x128xf32, #tpu.memory_space<vmem>>, vector<8x128xf32>
    tpu.vector_store %arg1[%c0_1, %c0_2], %1 {strides = array<i32>} : memref<8x128xf32, #tpu.memory_space<vmem>>, vector<8x128xf32>,
    return
  }
}

</mosaic_0001>

<bundles_post_ra>
// kernel: tpu_custom_call.1
= control target key start
LH: loop header
LB: loop body
LE: loop exit
PB: predicated region body
PF: predicated region fallthrough
CT: control target
= control target key end

     0   :  { %6 = vsyncpa [#allocation3], 0  ;;  %s106_s0 = inlined_call_operand.hbm [shape: f32[8,128], index: 0, kind: input, shape index: {}]   ;;  %s107_s1 = inlined_call_operand.hbm [shape: f32[8,128], index: 1, kind: output, shape index: {}]  }
   0x1   :  { %7 = vsyncpa [#allocation4], 0  ;;  %s87_s6 = smov [#allocation2]  }
   0x2   :  { %s14_s7 = sshll.u32 %s87_s6, 4  ;;  %s15_s7 = int_to_ptr.vmem [resolvable:$true] %s14_s7 }
   0x3   :  { %s51_s8 = scalar_lea.vmem %s15_s7, 128  ;;  %p56_p1 = scmp.lt.s32.totalorder %s15_s7, %s15_s7 }
   0x4   :  { %p52_p0 = scmp.ne.s32.totalorder %s15_s7, %s51_s8  ;;  %p57_p2 = scmp.lt.s32.totalorder %s51_s8, %s51_s8 }
   0x6   :  { %p58_p3 = por %p57_p2, %p56_p1 }
   0x8   :  { %p59_p4 = pnand %p58_p3, %p52_p0 }
   0xa   :  { %62 = shalt.err (!%p59_p4)
}
   0xb   :  { %17 = dma.hbm_to_vmem [thread:$0]  %s106_s0, 128, %s15_s7, [#allocation3]  }
   0xc   :  { %83 = dma.done.wait [#allocation3], 128  }
   0xd   :  { %84 = vsyncadd [#allocation3], 4294967168  ;;  %v21_v0 = vld [vmem:[#allocation2] sm:$0xff]  ;;  %s88_s11 = smov 1   ;;  %s89_s12 = smov [#allocation5]  }
   0xe   :  { %22 = vrot.lane.b32.xlu0 %v21_v0, %s88_s11  ;;  %s31_s13 = sshll.u32 %s89_s12, 4  ;;  %s32_s13 = int_to_ptr.vmem [resolvable:$true] %s31_s13 }
   0xf   :  { %s63_s14 = scalar_lea.vmem %s32_s13, 128  ;;  %p68_p6 = scmp.lt.s32.totalorder %s32_s13, %s32_s13 }
  0x10   :  { %p64_p5 = scmp.ne.s32.totalorder %s32_s13, %s63_s14  ;;  %p69_p7 = scmp.lt.s32.totalorder %s63_s14, %s63_s14 }
  0x12   :  { %p70_p8 = por %p69_p7, %p68_p6 }
  0x14   :  { %p71_p9 = pnand %p70_p8, %p64_p5 }
  0x80   :  { %v23_v1 = vpop.permute.xlu0 %22 }
  0x81   :  { %24 = vst [vmem:[#allocation5] sm:$0xff] %v23_v1 }
  0x82   :  { %74 = shalt.err (!%p71_p9)
}
  0x83   :  { %34 = dma.vmem_to_hbm [thread:$0]  %s32_s13, 128, %s107_s1, [#allocation4]  }
  0x84   :  { %85 = dma.done.wait [#allocation4], 128  }
  0x85   :  { %86 = vsyncadd [#allocation4], 4294967168 }
  0x86   :  { %38 = vsyncpa [#allocation3], 1 }
  0x87   :  { %39 = vsyncpa [#allocation4], 1 }

</bundles_post_ra>
